<compile_context>
chip_gen: v7x
topology: tpu7x:2x2x1
jax: 0.10.0
libtpu: 0.0.40
codegen_flags: <defaults>
</compile_context>

<pallas_src>
import functools

import jax
import jax.numpy as jnp
from jax.experimental import pallas as pl
from jax.experimental.pallas import tpu as pltpu

_LANE = 128


def _round_up(x: int, m: int) -> int:
    return (x + m - 1) // m * m


def _fused_mlp_kernel(x_ref, w1_ref, b1_ref, w2_ref, b2_ref, out_ref):
    """One batch tile of the fused (policy ++ value) 2-layer MLP extractor."""
    # Layer 1 (both branches at once): (TILE_B, D) @ (D, 2H) -> f32 acc.
    h = jnp.tanh(
        jnp.dot(x_ref[...], w1_ref[...], preferred_element_type=jnp.float32)
        + b1_ref[...].astype(jnp.float32)
    )
    # Layer 2: block-diagonal weight keeps pi / vf features separated; output
    # dim is lane-padded so the store below is a full unmasked vst.
    y = jnp.tanh(
        jnp.dot(h.astype(w2_ref.dtype), w2_ref[...],
                preferred_element_type=jnp.float32)
        + b2_ref[...].astype(jnp.float32)
    )
    out_ref[...] = y.astype(out_ref.dtype)


def pack_fused_params(params):
    """Precompute (once) the fused weight layout used by the kernel.

    Returns dict with:
      w1: (D, H_pi + H_vf)              lane-concatenated layer-1 weights
      b1: (1, H_pi + H_vf)
      w2: (H_pi + H_vf, D2p)            block-diagonal layer-2 weights,
                                        D2p = round_up(d_pi + d_vf, 128)
      b2: (1, D2p)
      d_pi, d_vf: output split sizes (padding columns sliced off in wrapper)
    """
    w1_pi, w1_vf = params["w1_pi"], params["w1_vf"]
    w2_pi, w2_vf = params["w2_pi"], params["w2_vf"]
    h_pi, d_pi = w2_pi.shape
    h_vf, d_vf = w2_vf.shape
    d2 = d_pi + d_vf
    d2p = _round_up(d2, _LANE)

    w1 = jnp.concatenate([w1_pi, w1_vf], axis=1)
    b1 = jnp.concatenate([params["b1_pi"], params["b1_vf"]], axis=1)

    w2 = jnp.zeros((h_pi + h_vf, d2p), dtype=w2_pi.dtype)
    w2 = w2.at[:h_pi, :d_pi].set(w2_pi)
    w2 = w2.at[h_pi:, d_pi:d2].set(w2_vf)
    b2 = jnp.zeros((1, d2p), dtype=params["b2_pi"].dtype)
    b2 = b2.at[:, :d_pi].set(params["b2_pi"])
    b2 = b2.at[:, d_pi:d2].set(params["b2_vf"])

    return dict(w1=w1, b1=b1, w2=w2, b2=b2, d_pi=d_pi, d_vf=d_vf)


@functools.partial(jax.jit, static_argnames=("tile_b",))
def _fused_forward(features, w1, b1, w2, b2, *, tile_b):
    B, D = features.shape
    H2 = w1.shape[1]
    D2p = w2.shape[1]

    # Batch tiling: TILE_B rows per grid step; pad B up so the grid is exact.
    # (tanh(0 @ W + b) in padded rows is harmless and sliced off afterwards.)
    TILE_B = min(tile_b, _round_up(B, 8))
    pB = _round_up(B, TILE_B)
    x = features
    if pB != B:
        x = jnp.pad(features, ((0, pB - B), (0, 0)))

    grid = (pl.cdiv(pB, TILE_B),)

    itemsize = jnp.dtype(features.dtype).itemsize
    cost = pl.CostEstimate(
        flops=2 * pB * (D * H2 + H2 * D2p),
        transcendentals=pB * (H2 + D2p),
        bytes_accessed=itemsize * (pB * D + D * H2 + H2 + H2 * D2p + D2p + pB * D2p),
    )

    out = pl.pallas_call(
        _fused_mlp_kernel,
        out_shape=jax.ShapeDtypeStruct((pB, D2p), features.dtype),
        grid=grid,
        in_specs=[
            pl.BlockSpec((TILE_B, D), lambda i: (i, 0)),    # x: tiled on batch
            pl.BlockSpec((D, H2), lambda i: (0, 0)),        # w1: resident
            pl.BlockSpec((1, H2), lambda i: (0, 0)),        # b1: resident
            pl.BlockSpec((H2, D2p), lambda i: (0, 0)),      # w2: resident
            pl.BlockSpec((1, D2p), lambda i: (0, 0)),       # b2: resident
        ],
        out_specs=pl.BlockSpec((TILE_B, D2p), lambda i: (i, 0)),
        compiler_params=pltpu.CompilerParams(
            dimension_semantics=("parallel",),      # megacore sharding on v7x
            vmem_limit_bytes=64 * 1024 * 1024,      # allow roofline-sized tiles
        ),
        cost_estimate=cost,
    )(x, w1, b1, w2, b2)

    return out[:B]


def reg_mlp_extractor_forward(features, fused_params, *, tile_b=256):
    """features: (B, feature_dim). fused_params: output of pack_fused_params.

    Returns (latent_pi, latent_vf). Split of the lane-concatenated kernel output
    (and removal of the lane padding) happens here, outside the kernel, so the
    kernel's store stays lane-dense.
    """
    d_pi = fused_params["d_pi"]
    d_vf = fused_params["d_vf"]
    out = _fused_forward(
        features,
        fused_params["w1"], fused_params["b1"],
        fused_params["w2"], fused_params["b2"],
        tile_b=tile_b,
    )
    return out[:, :d_pi], out[:, d_pi:d_pi + d_vf]


def init_params(key, feature_dim, net_arch):
    """Deterministic synthetic parameters. Linear weights stored (in, out); bias (1, out)."""
    pi_dims = net_arch["pi"] if isinstance(net_arch, dict) else net_arch
    vf_dims = net_arch["vf"] if isinstance(net_arch, dict) else net_arch
    assert len(pi_dims) == 2 and len(vf_dims) == 2, "this script builds the 2-layer case"

    def linear(key, fan_in, fan_out):
        kw, kb = jax.random.split(key)
        bound = 1.0 / jnp.sqrt(fan_in)
        w = jax.random.uniform(kw, (fan_in, fan_out), jnp.float32, -bound, bound)
        b = jax.random.uniform(kb, (1, fan_out), jnp.float32, -bound, bound)
        return w, b

    keys = jax.random.split(key, 4)
    w1p, b1p = linear(keys[0], feature_dim, pi_dims[0])
    w2p, b2p = linear(keys[1], pi_dims[0], pi_dims[1])
    w1v, b1v = linear(keys[2], feature_dim, vf_dims[0])
    w2v, b2v = linear(keys[3], vf_dims[0], vf_dims[1])
    return dict(w1_pi=w1p, b1_pi=b1p, w2_pi=w2p, b2_pi=b2p,
                w1_vf=w1v, b1_vf=b1v, w2_vf=w2v, b2_vf=b2v)


def _reference(features, p):
    h = jnp.tanh(features @ p["w1_pi"] + p["b1_pi"])
    pi = jnp.tanh(h @ p["w2_pi"] + p["b2_pi"])
    h = jnp.tanh(features @ p["w1_vf"] + p["b1_vf"])
    vf = jnp.tanh(h @ p["w2_vf"] + p["b2_vf"])
    return pi, vf


if __name__ == "__main__":
    key = jax.random.PRNGKey(0)
    k_feat, k_param, k_feat2 = jax.random.split(key, 3)

    feature_dim = 32
    net_arch = [32, 32]  # pi == vf dims, list-style net_arch
    params = init_params(k_param, feature_dim, net_arch)
    fused = pack_fused_params(params)  # precomputed once, reused per forward

    # Primary small case.
    batch = 8
    features = jax.random.normal(k_feat, (batch, feature_dim), jnp.float32)
    latent_pi, latent_vf = reg_mlp_extractor_forward(features, fused)
    jax.block_until_ready((latent_pi, latent_vf))

    ref_pi, ref_vf = _reference(features, params)
    assert latent_pi.shape == (batch, net_arch[-1])
    assert latent_vf.shape == (batch, net_arch[-1])
    assert jnp.allclose(latent_pi, ref_pi, atol=1e-5, rtol=1e-5)
    assert jnp.allclose(latent_vf, ref_vf, atol=1e-5, rtol=1e-5)

    # Padding / odd-batch path.
    batch2 = 5
    features2 = jax.random.normal(k_feat2, (batch2, feature_dim), jnp.float32)
    pi2, vf2 = reg_mlp_extractor_forward(features2, fused)
    jax.block_until_ready((pi2, vf2))
    ref_pi2, ref_vf2 = _reference(features2, params)
    assert pi2.shape == (batch2, net_arch[-1]) and vf2.shape == (batch2, net_arch[-1])
    assert jnp.allclose(pi2, ref_pi2, atol=1e-5, rtol=1e-5)
    assert jnp.allclose(vf2, ref_vf2, atol=1e-5, rtol=1e-5)

    print("KERNEL_OK")
</pallas_src>

<mosaic_0001>
module attributes {stable_mosaic.version = 11 : i64} {
  func.func @_fused_mlp_kernel(%arg0: i32, %arg1: memref<8x32xf32, #tpu.memory_space<vmem>>, %arg2: memref<32x64xf32, #tpu.memory_space<vmem>>, %arg3: memref<1x64xf32, #tpu.memory_space<vmem>>, %arg4: memref<64x128xf32, #tpu.memory_space<vmem>>, %arg5: memref<1x128xf32, #tpu.memory_space<vmem>>, %arg6: memref<8x128xf32, #tpu.memory_space<vmem>>) attributes {dimension_semantics = [#tpu.dimension_semantics<parallel>], iteration_bounds = array<i64: 1>, scalar_prefetch = 0 : i64, scratch_operands = 0 : i64, tpu.core_type = #tpu.core_type<tc>, window_params = [{transform_indices = @transform_0, window_bounds = array<i64: 8, 32>}, {pipeline_mode = #tpu.pipeline_mode<synchronous>, transform_indices = @transform_1, window_bounds = array<i64: 32, 64>}, {pipeline_mode = #tpu.pipeline_mode<synchronous>, transform_indices = @transform_2, window_bounds = array<i64: 1, 64>}, {pipeline_mode = #tpu.pipeline_mode<synchronous>, transform_indices = @transform_3, window_bounds = array<i64: 64, 128>}, {pipeline_mode = #tpu.pipeline_mode<synchronous>, transform_indices = @transform_4, window_bounds = array<i64: 1, 128>}, {transform_indices = @transform_5, window_bounds = array<i64: 8, 128>}]} {
    %c0 = arith.constant 0 : index
    %c0_0 = arith.constant 0 : index
    %0 = vector.load %arg1[%c0, %c0_0] : memref<8x32xf32, #tpu.memory_space<vmem>>, vector<8x32xf32>
    %c0_1 = arith.constant 0 : index
    %c0_2 = arith.constant 0 : index
    %1 = vector.load %arg2[%c0_1, %c0_2] : memref<32x64xf32, #tpu.memory_space<vmem>>, vector<32x64xf32>
    %cst = arith.constant dense<0.000000e+00> : vector<8x64xf32>
    %2 = tpu.matmul %0, %1, %cst {dimension_numbers = #tpu.dot_dimension_numbers<[1], [0], [0], [1], [0, 0, 1, 1], [], []>} : vector<8x32xf32>, vector<32x64xf32>, vector<8x64xf32> -> vector<8x64xf32>
    %c0_3 = arith.constant 0 : index
    %c0_4 = arith.constant 0 : index
    %3 = vector.load %arg3[%c0_3, %c0_4] : memref<1x64xf32, #tpu.memory_space<vmem>>, vector<1x64xf32>
    %4 = vector.broadcast %3 : vector<1x64xf32> to vector<8x64xf32>
    %5 = arith.addf %2, %4 : vector<8x64xf32>
    %6 = math.tanh %5 : vector<8x64xf32>
    %c0_5 = arith.constant 0 : index
    %c0_6 = arith.constant 0 : index
    %7 = vector.load %arg4[%c0_5, %c0_6] : memref<64x128xf32, #tpu.memory_space<vmem>>, vector<64x128xf32>
    %cst_7 = arith.constant dense<0.000000e+00> : vector<8x128xf32>
    %8 = tpu.matmul %6, %7, %cst_7 {dimension_numbers = #tpu.dot_dimension_numbers<[1], [0], [0], [1], [0, 0, 1, 1], [], []>} : vector<8x64xf32>, vector<64x128xf32>, vector<8x128xf32> -> vector<8x128xf32>
    %c0_8 = arith.constant 0 : index
    %c0_9 = arith.constant 0 : index
    %9 = vector.load %arg5[%c0_8, %c0_9] : memref<1x128xf32, #tpu.memory_space<vmem>>, vector<1x128xf32>
    %10 = vector.broadcast %9 : vector<1x128xf32> to vector<8x128xf32>
    %11 = arith.addf %8, %10 : vector<8x128xf32>
    %12 = math.tanh %11 : vector<8x128xf32>
    %c0_10 = arith.constant 0 : index
    %c0_11 = arith.constant 0 : index
    %13 = vector.load %arg6[%c0_10, %c0_11] : memref<8x128xf32, #tpu.memory_space<vmem>>, vector<8x128xf32>
    tpu.vector_store %arg6[%c0_10, %c0_11], %12 {strides = array<i32>} : memref<8x128xf32, #tpu.memory_space<vmem>>, vector<8x128xf32>,
    return
  }
  func.func @transform_0(%arg0: i32) -> (i32, i32) {
    %c0_i32 = arith.constant 0 : i32
    %c0_i32_0 = arith.constant 0 : i32
    return %arg0, %c0_i32 : i32, i32
  }
  func.func @transform_1(%arg0: i32) -> (i32, i32) {
    %c0_i32 = arith.constant 0 : i32
    %c0_i32_0 = arith.constant 0 : i32
    %c0_i32_1 = arith.constant 0 : i32
    return %c0_i32, %c0_i32_0 : i32, i32
  }
  func.func @transform_2(%arg0: i32) -> (i32, i32) {
    %c0_i32 = arith.constant 0 : i32
    %c0_i32_0 = arith.constant 0 : i32
    %c0_i32_1 = arith.constant 0 : i32
    return %c0_i32, %c0_i32_0 : i32, i32
  }
  func.func @transform_3(%arg0: i32) -> (i32, i32) {
    %c0_i32 = arith.constant 0 : i32
    %c0_i32_0 = arith.constant 0 : i32
    %c0_i32_1 = arith.constant 0 : i32
    return %c0_i32, %c0_i32_0 : i32, i32
  }
  func.func @transform_4(%arg0: i32) -> (i32, i32) {
    %c0_i32 = arith.constant 0 : i32
    %c0_i32_0 = arith.constant 0 : i32
    %c0_i32_1 = arith.constant 0 : i32
    return %c0_i32, %c0_i32_0 : i32, i32
  }
  func.func @transform_5(%arg0: i32) -> (i32, i32) {
    %c0_i32 = arith.constant 0 : i32
    %c0_i32_0 = arith.constant 0 : i32
    return %arg0, %c0_i32 : i32, i32
  }
}

</mosaic_0001>

<bundles_post_ra>
// kernel: _fused_forward.1
= control target key start
LH: loop header
LB: loop body
LE: loop exit
PB: predicated region body
PF: predicated region fallthrough
CT: control target
= control target key end

     0   :  { %10 = vsyncpa [#allocation3], 0  ;;  %s612_s0 = inlined_call_operand.hbm [shape: f32[8,32], index: 0, kind: input, shape index: {}]   ;;  %s613_s1 = inlined_call_operand.hbm [shape: f32[32,64], index: 1, kind: input, shape index: {}]   ;;  %s614_s2 = inlined_call_operand.hbm [shape: f32[1,64], index: 2, kind: input, shape index: {}]   ;;  %s615_s3 = inlined_call_operand.hbm [shape: f32[64,128], index: 3, kind: input, shape index: {}]   ;;  %s616_s4 = inlined_call_operand.hbm [shape: f32[1,128], index: 4, kind: input, shape index: {}]   ;;  %s617_s5 = inlined_call_operand.hbm [shape: f32[8,128], index: 5, kind: output, shape index: {}]  }
   0x1   :  { %11 = vsyncpa [#allocation6], 0 }
   0x2   :  { %12 = vsyncpa [#allocation9], 0 }
   0x3   :  { %13 = vsyncpa [#allocation4], 0  ;;  %s499_s18 = smov [#allocation5]   ;;  %s359_s22 = scalar_lea.hbm %s613_s1, 512 }
   0x4   :  { %s29_s19 = sshll.u32 %s499_s18, 4  ;;  %p360_p0 = scmp.ne.s32.totalorder %s613_s1, %s359_s22  ;;  %s30_s19 = int_to_ptr.vmem [resolvable:$true] %s29_s19 }
   0x5   :  { %p363_p1 = scmp.lt.u32.totalorder %s359_s22, %s613_s1 }
   0x7   :  { %p365_p2 = pnand %p363_p1, %p360_p0 }
   0x9   :  { %368 = shalt.err (!%p365_p2)
}
   0xa   :  { %s369_s27 = scalar_lea.vmem %s30_s19, 512  ;;  %p374_p4 = scmp.lt.s32.totalorder %s30_s19, %s30_s19 }
   0xb   :  { %p370_p3 = scmp.ne.s32.totalorder %s30_s19, %s369_s27  ;;  %p375_p5 = scmp.lt.s32.totalorder %s369_s27, %s369_s27 }
   0xd   :  { %p376_p6 = por %p375_p5, %p374_p4 }
   0xf   :  { %p377_p7 = pnand %p376_p6, %p370_p3 }
  0x11   :  { %380 = shalt.err (!%p377_p7)
}
  0x12   :  { %s500_s28 = smov 128   ;;  %s501_s29 = smov 8  }
  0x13   :  { %35 = dma.hbm_to_vmem [thread:$0]  %s613_s1, 512, %s30_s19, [#allocation6], %s500_s28, %s500_s28, %s501_s29  }
  0x14   :  { %s502_s7 = smov [#allocation8]   ;;  %s503_s9 = smov [#allocation2]  }
  0x15   :  { %s51_s8 = sshll.u32 %s502_s7, 4  ;;  %s20_s10 = sshll.u32 %s503_s9, 4  ;;  %s52_s8 = int_to_ptr.vmem [resolvable:$true] %s51_s8  ;;  %s21_s10 = int_to_ptr.vmem [resolvable:$true] %s20_s10 }
  0x16   :  { %s381_s13 = scalar_lea.hbm %s615_s3, 1024 }
  0x17   :  { %p382_p8 = scmp.ne.s32.totalorder %s615_s3, %s381_s13  ;;  %p385_p9 = scmp.lt.u32.totalorder %s381_s13, %s615_s3 }
  0x19   :  { %p387_p10 = pnand %p385_p9, %p382_p8 }
  0x1b   :  { %390 = shalt.err (!%p387_p10)
}
  0x1c   :  { %s391_s1 = scalar_lea.vmem %s52_s8, 1024  ;;  %p396_p12 = scmp.lt.s32.totalorder %s52_s8, %s52_s8 }
  0x1d   :  { %p392_p11 = scmp.ne.s32.totalorder %s52_s8, %s391_s1  ;;  %p397_p13 = scmp.lt.s32.totalorder %s391_s1, %s391_s1 }
  0x1f   :  { %p398_p0 = por %p397_p13, %p396_p12 }
  0x21   :  { %p399_p1 = pnand %p398_p0, %p392_p11 }
  0x23   :  { %402 = shalt.err (!%p399_p1)
}
  0x24   :  { %57 = dma.hbm_to_vmem [thread:$0]  %s615_s3, 1024, %s52_s8, [#allocation9], %s500_s28, %s500_s28, %s501_s29  }
  0x25   :  { %s403_s22 = scalar_lea.hbm %s612_s0, 128 }
  0x26   :  { %p404_p2 = scmp.ne.s32.totalorder %s612_s0, %s403_s22  ;;  %p407_p3 = scmp.lt.u32.totalorder %s403_s22, %s612_s0 }
  0x28   :  { %p409_p4 = pnand %p407_p3, %p404_p2 }
  0x2a   :  { %412 = shalt.err (!%p409_p4)
}
  0x2b   :  { %s413_s27 = scalar_lea.vmem %s21_s10, 128  ;;  %p418_p6 = scmp.lt.s32.totalorder %s21_s10, %s21_s10 }
  0x2c   :  { %p414_p5 = scmp.ne.s32.totalorder %s21_s10, %s413_s27  ;;  %p419_p7 = scmp.lt.s32.totalorder %s413_s27, %s413_s27 }
  0x2e   :  { %p420_p8 = por %p419_p7, %p418_p6 }
  0x30   :  { %p421_p9 = pnand %p420_p8, %p414_p5 }
  0x32   :  { %424 = shalt.err (!%p421_p9)
}
  0x33   :  { %23 = dma.hbm_to_vmem [thread:$0]  %s612_s0, 128, %s21_s10, [#allocation3]  }
  0x34   :  { %s504_s29 = smov [#allocation7]   ;;  %s505_s6 = smov [#allocation10]  }
  0x35   :  { %s42_s30 = sshll.u32 %s504_s29, 4  ;;  %s64_s7 = sshll.u32 %s505_s6, 4  ;;  %s43_s30 = int_to_ptr.vmem [resolvable:$true] %s42_s30  ;;  %s65_s7 = int_to_ptr.vmem [resolvable:$true] %s64_s7 }
  0x36   :  { %s425_s11 = scalar_lea.hbm %s614_s2, 16 }
  0x37   :  { %p426_p10 = scmp.ne.s32.totalorder %s614_s2, %s425_s11  ;;  %p429_p11 = scmp.lt.u32.totalorder %s425_s11, %s614_s2 }
  0x39   :  { %p431_p12 = pnand %p429_p11, %p426_p10 }
  0x3b   :  { %434 = shalt.err (!%p431_p12)
}
  0x3c   :  { %s435_s0 = scalar_lea.vmem %s43_s30, 16  ;;  %s439_s10 = scalar_lea.vmem %s43_s30, 32 }
  0x3d   :  { %p436_p13 = scmp.ne.s32.totalorder %s43_s30, %s435_s0  ;;  %p440_p0 = scmp.lt.s32.totalorder %s43_s30, %s43_s30 }
  0x3e   :  { %p441_p1 = scmp.lt.s32.totalorder %s439_s10, %s435_s0 }
  0x40   :  { %p442_p2 = por %p441_p1, %p440_p0 }
  0x42   :  { %p443_p3 = pnand %p442_p2, %p436_p13 }
  0x44   :  { %446 = shalt.err (!%p443_p3)
}
  0x45   :  { %45 = dma.hbm_to_vmem [thread:$0]  %s614_s2, 16, %s43_s30, [#allocation6]  }
  0x46   :  { %s447_s19 = scalar_lea.hbm %s616_s4, 16 }
  0x47   :  { %p448_p4 = scmp.ne.s32.totalorder %s616_s4, %s447_s19  ;;  %p451_p5 = scmp.lt.u32.totalorder %s447_s19, %s616_s4 }
  0x49   :  { %p453_p6 = pnand %p451_p5, %p448_p4 }
  0x4b   :  { %456 = shalt.err (!%p453_p6)
}
  0x4c   :  { %s457_s24 = scalar_lea.vmem %s65_s7, 16  ;;  %s461_s25 = scalar_lea.vmem %s65_s7, 32 }
  0x4d   :  { %p458_p7 = scmp.ne.s32.totalorder %s65_s7, %s457_s24  ;;  %p462_p8 = scmp.lt.s32.totalorder %s65_s7, %s65_s7 }
  0x4e   :  { %p463_p9 = scmp.lt.s32.totalorder %s461_s25, %s457_s24 }
  0x50   :  { %p464_p10 = por %p463_p9, %p462_p8 }
  0x52   :  { %p465_p11 = pnand %p464_p10, %p458_p7 }
  0x54   :  { %468 = shalt.err (!%p465_p11)
}
  0x55   :  { %67 = dma.hbm_to_vmem [thread:$0]  %s616_s4, 16, %s65_s7, [#allocation9]  }
  0x56   :  { %491 = dma.done.wait [#allocation3], 128  }
  0x57   :  { %492 = vsyncadd [#allocation3], 4294967168 }
  0x58   :  { %493 = dma.done.wait [#allocation6], 528  }
  0x59   :  { %494 = vsyncadd [#allocation6], 4294966768 }
  0x5a   :  { %495 = dma.done.wait [#allocation9], 1040  }
  0x5b   :  { %496 = vsyncadd [#allocation9], 4294966256  ;;  %v506_v0 = vmov 0.0|0.0   ;;  %vm507_vm0 = vmmov 0   ;;  %v508_v1 = vmov 0.0   ;;  %v84_v2 = vld [vmem:[#allocation5] sm:$0xff] }
  0x5c   :  { %326 = vmatprep.subr.bf16.mxu0 %v506_v0  ;;  %304 = vmatprep.mubr.msk.f32.mxu0 %vm507_vm0, %v508_v1  ;;  %v85_v3 = vld [vmem:[#allocation5 + $0x8] sm:$0xff]  ;;  %v86_v4 = vld [vmem:[#allocation5 + $0x10] sm:$0xff]  ;;  %v87_v6 = vld [vmem:[#allocation5 + $0x18] sm:$0xff]  ;;  %vm95_vm1 = vcmask 261120   ;;  %vm185_vm2 = vcmask 523264   ;;  %s509_s4 = smov [#allocation11]  }
  0x5d   :  { %332 = vmatprep.subr.bf16.mxu1 %v506_v0  ;;  %323 = vmatprep.mubr.msk.f32.mxu1 %vm507_vm0, %v508_v1  ;;  %v327_v5 = vpack.c.bf16 %v85_v3, %v84_v2  ;;  %v170_v7 = vld [vmem:[#allocation8] sm:$0xff]  ;;  %v171_v8 = vld [vmem:[#allocation8 + $0x8] sm:$0xff]  ;;  %v330_v9 = vpack.c.bf16 %v87_v6, %v86_v4  ;;  %v83_v11 = vld [vmem:[#allocation2] sm:$0xff]  ;;  %s267_s27 = sshll.u32 %s509_s4, 4  ;;  %s268_s27 = int_to_ptr.vmem [resolvable:$true] %s267_s27 }
  0x5e   :  { %v333_v10 = vpack.c.bf16 %v171_v8, %v170_v7  ;;  %v172_v12 = vld [vmem:[#allocation8 + $0x10] sm:$0xff]  ;;  %v173_v13 = vld [vmem:[#allocation8 + $0x18] sm:$0xff]  ;;  %v174_v15 = vld [vmem:[#allocation8 + $0x20] sm:$0xff]  ;;  %s469_s3 = scalar_lea.vmem %s268_s27, 128  ;;  %p474_p13 = scmp.lt.s32.totalorder %s268_s27, %s268_s27 }
  0x5f   :  { %328 = vmatpush3.bf16.msra.mxu0 %v327_v5  ;;  %v336_v14 = vpack.c.bf16 %v173_v13, %v172_v12  ;;  %v175_v16 = vld [vmem:[#allocation8 + $0x28] sm:$0xff]  ;;  %v176_v18 = vld [vmem:[#allocation8 + $0x30] sm:$0xff]  ;;  %v177_v19 = vld [vmem:[#allocation8 + $0x38] sm:$0xff]  ;;  %p470_p12 = scmp.ne.s32.totalorder %s268_s27, %s469_s3  ;;  %p475_p0 = scmp.lt.s32.totalorder %s469_s3, %s469_s3 }
  0x60   :  { %329 = vmatprep.subr.bf16.mxu0 %v506_v0  ;;  %334 = vmatpush3.bf16.msra.mxu1 %v333_v10  ;;  %v339_v17 = vpack.c.bf16 %v175_v16, %v174_v15  ;;  %v342_v20 = vpack.c.bf16 %v177_v19, %v176_v18  ;;  %v278_v21 = vld [vmem:[#allocation7] ss:$0 sm:$0xff]  ;;  %v280_v26 = vld [vmem:[#allocation10] ss:$0 sm:$0xff] }
  0x61   :  { %335 = vmatprep.subr.bf16.mxu1 %v506_v0  ;;  %p476_p1 = por %p475_p0, %p474_p13 }
  0x63   :  { %331 = vmatpush3.bf16.msra.mxu0 %v330_v9  ;;  %p477_p2 = pnand %p476_p1, %p470_p12 }
  0x64   :  { %337 = vmatpush3.bf16.msra.mxu1 %v336_v14 }
  0x65   :  { %338 = vmatprep.subr.bf16.mxu1 %v506_v0 }
  0x66   :  { %305 = vmatmul.mubr.msk.f32.vlgmr.msra.gmra.mrb[0].mxu0 %vm95_vm1, %v83_v11 }
  0x68   :  { %340 = vmatpush3.bf16.msra.mxu1 %v339_v17 }
  0x69   :  { %341 = vmatprep.subr.bf16.mxu1 %v506_v0 }
  0x6c   :  { %343 = vmatpush3.bf16.msra.mxu1 %v342_v20 }
 0x139   :  { %v165_v22 = vpop.f32.mrb[0].mxu0 }
 0x13a   :  { %v166_v23 = vadd.f32 %v278_v21, %v165_v22  ;;  %v306_v24 = vpop.f32.mrb[1].mxu0 }
 0x13c   :  { %355 = vtanh.f32 %v166_v23 }
 0x146   :  { %v356_v25 = vpop.eup %355 }
 0x147   :  { %324 = vmatmul.mubr.msk.f32.vlgmr.msra.gmra.mrb[0].mxu1 %vm185_vm2, %v356_v25 }
 0x21a   :  { %v255_v27 = vpop.f32.mrb[0].mxu1 }
 0x21b   :  { %v256_v28 = vadd.f32 %v280_v26, %v255_v27  ;;  %v325_v29 = vpop.f32.mrb[1].mxu1 }
 0x21d   :  { %357 = vtanh.f32 %v256_v28 }
 0x227   :  { %v358_v30 = vpop.eup %357 }
 0x228   :  { %260 = vst [vmem:[#allocation11] sm:$0xff] %v358_v30 }
 0x229   :  { %480 = shalt.err (!%p477_p2)
}
 0x22a   :  { %s481_s30 = scalar_lea.hbm %s617_s5, 128 }
 0x22b   :  { %p482_p3 = scmp.ne.s32.totalorder %s617_s5, %s481_s30  ;;  %p485_p4 = scmp.lt.u32.totalorder %s481_s30, %s617_s5 }
 0x22d   :  { %p487_p5 = pnand %p485_p4, %p482_p3 }
 0x22f   :  { %490 = shalt.err (!%p487_p5)
}
 0x230   :  { %270 = dma.vmem_to_hbm [thread:$0]  %s268_s27, 128, %s617_s5, [#allocation4]  }
 0x231   :  { %497 = dma.done.wait [#allocation4], 128  }
 0x232   :  { %498 = vsyncadd [#allocation4], 4294967168 }
 0x233   :  { %274 = vsyncpa [#allocation3], 1 }
 0x234   :  { %275 = vsyncpa [#allocation6], 1 }
 0x235   :  { %276 = vsyncpa [#allocation9], 1 }
 0x236   :  { %277 = vsyncpa [#allocation4], 1 }

</bundles_post_ra>
